<compile_context>
chip_gen: v6e
topology: v6e:2x2x1
jax: 0.10.0
libtpu: 0.0.40
codegen_flags: <defaults>
</compile_context>

<pallas_src>
import functools

import jax
import jax.numpy as jnp
from jax.experimental import pallas as pl
from jax.experimental.pallas import tpu as pltpu

EPSILON = 0.01  # matches LabelSmoothingCrossEntropy(epsilon=0.01), reduction='mean'


def _round_up(x, m):
    return (x + m - 1) // m * m


def _ls_ce_kernel(preds_ref, tgt_ref, loss_ref, nll_ref, *,
                  n_rows, n_cols, rows_padded, cols_padded):
    """One batch tile: emit partial sums of loss_row and nll_row.

    preds_ref: (TB, Cpad) float VMEM tile
    tgt_ref:   (TB, 1) int32 VMEM tile
    loss_ref, nll_ref: (1, 1, 1) float32 per-tile partial outputs
    """
    tb, cp = preds_ref.shape
    x = preds_ref[...].astype(jnp.float32)                        # (TB, Cpad)

    col_ids = jax.lax.broadcasted_iota(jnp.int32, (tb, cp), 1)    # (TB, Cpad)

    if cols_padded:
        col_valid = col_ids < n_cols
        x = jnp.where(col_valid, x, jnp.float32(-1e30))

    # Numerically stable log-softmax statistics (no (TB,C) log_preds tensor).
    m = jnp.max(x, axis=-1, keepdims=True)                        # (TB, 1)
    shifted = x - m
    ex = jnp.exp(shifted)                                         # EUP, ~free
    if cols_padded:
        ex = jnp.where(col_valid, ex, jnp.float32(0.0))
        shifted_sum_src = jnp.where(col_valid, shifted, jnp.float32(0.0))
    else:
        shifted_sum_src = shifted
    lse = jnp.log(jnp.sum(ex, axis=-1, keepdims=True))            # (TB, 1)
    s = jnp.sum(shifted_sum_src, axis=-1, keepdims=True)          # (TB, 1)

    # loss_row = -sum_c log_preds = C * lse - sum_c shifted
    loss_rows = jnp.float32(n_cols) * lse - s                     # (TB, 1)

    # nll_row = -log_preds[target] = lse - shifted[target]
    tgt_hit = col_ids == tgt_ref[...]                             # (TB, Cpad)
    tgt_shifted = jnp.sum(jnp.where(tgt_hit, shifted, jnp.float32(0.0)),
                          axis=-1, keepdims=True)                 # (TB, 1)
    nll_rows = lse - tgt_shifted                                  # (TB, 1)

    if rows_padded:
        row_ids = (pl.program_id(0) * tb
                   + jax.lax.broadcasted_iota(jnp.int32, (tb, 1), 0))
        valid = (row_ids < n_rows).astype(jnp.float32)
        loss_rows = loss_rows * valid
        nll_rows = nll_rows * valid

    loss_ref[...] = jnp.sum(loss_rows).reshape(1, 1, 1)
    nll_ref[...] = jnp.sum(nll_rows).reshape(1, 1, 1)


@functools.partial(jax.jit, static_argnames=("block_rows",))
def label_smoothing_cross_entropy(preds, target, block_rows=None):
    """preds: (B, C) float; target: (B,) int. Returns scalar float32 loss."""
    b, c = preds.shape
    itemsize = jnp.dtype(preds.dtype).itemsize
    sub = {4: 8, 2: 16, 1: 32}.get(itemsize, 8)       # sublane multiple per dtype

    # Lane-dense class dimension.
    c_pad = max(_round_up(c, 128), 128)

    # Batch tile: ~4 MiB preds block (8 MiB double-buffered), capped at 512 rows.
    if block_rows is None:
        budget = 4 * 1024 * 1024
        tb = max(sub, (budget // (c_pad * itemsize)) // sub * sub)
        tb = min(tb, 512)
        tb = min(tb, _round_up(b, sub))
    else:
        assert block_rows % sub == 0, "block_rows must be a sublane multiple"
        tb = block_rows
    b_pad = _round_up(b, tb)
    num_tiles = b_pad // tb

    rows_padded = b_pad != b
    cols_padded = c_pad != c

    preds_p = preds
    if rows_padded or cols_padded:
        preds_p = jnp.pad(preds, ((0, b_pad - b), (0, c_pad - c)))
    tgt_p = target.astype(jnp.int32).reshape(b, 1)
    if rows_padded:
        tgt_p = jnp.pad(tgt_p, ((0, b_pad - b), (0, 0)))

    kernel = functools.partial(
        _ls_ce_kernel,
        n_rows=b, n_cols=c,
        rows_padded=rows_padded, cols_padded=cols_padded,
    )

    cost = pl.CostEstimate(
        flops=6 * b_pad * c_pad,
        transcendentals=b_pad * c_pad + b_pad,
        bytes_accessed=b_pad * c_pad * itemsize + b_pad * 4 + 2 * num_tiles * 4,
    )

    loss_parts, nll_parts = pl.pallas_call(
        kernel,
        out_shape=(
            jax.ShapeDtypeStruct((num_tiles, 1, 1), jnp.float32),
            jax.ShapeDtypeStruct((num_tiles, 1, 1), jnp.float32),
        ),
        grid=(num_tiles,),
        in_specs=[
            pl.BlockSpec((tb, c_pad), lambda i: (i, 0)),   # preds tile
            pl.BlockSpec((tb, 1), lambda i: (i, 0)),       # targets tile
        ],
        out_specs=(
            pl.BlockSpec((1, 1, 1), lambda i: (i, 0, 0)),  # per-tile loss partial
            pl.BlockSpec((1, 1, 1), lambda i: (i, 0, 0)),  # per-tile nll partial
        ),
        compiler_params=pltpu.CompilerParams(
            dimension_semantics=("parallel",),             # disjoint outputs -> megacore safe
            vmem_limit_bytes=40 * 1024 * 1024,
        ),
        cost_estimate=cost,
    )(preds_p, tgt_p)

    inv_b = jnp.float32(1.0 / b)
    loss = jnp.sum(loss_parts) * inv_b
    nll = jnp.sum(nll_parts) * inv_b
    eps = jnp.float32(EPSILON)
    return eps * (loss / jnp.float32(c)) + (jnp.float32(1.0) - eps) * nll


def _reference(preds, target):
    # pure-JAX reference mirroring the PyTorch forward
    n = preds.shape[-1]
    log_preds = jax.nn.log_softmax(preds.astype(jnp.float32), axis=-1)
    loss = jnp.mean(-jnp.sum(log_preds, axis=-1))
    nll = jnp.mean(-jnp.take_along_axis(log_preds, target[:, None], axis=-1)[:, 0])
    return EPSILON * (loss / n) + (1.0 - EPSILON) * nll


if __name__ == "__main__":
    key = jax.random.PRNGKey(0)
    k1, k2, k3, k4 = jax.random.split(key, 4)

    # Test 1: small shapes (class padding 32 -> 128 exercised).
    B, C = 8, 32
    preds = jax.random.normal(k1, (B, C), dtype=jnp.float32)
    target = jax.random.randint(k2, (B,), 0, C, dtype=jnp.int32)
    out = jax.block_until_ready(label_smoothing_cross_entropy(preds, target))
    ref = _reference(preds, target)
    assert jnp.allclose(out, ref, atol=1e-5, rtol=1e-5), (out, ref)

    # Test 2: multi-tile grid with row padding (B=20, TB=8 -> 3 tiles, 4 pad rows).
    B2, C2 = 20, 48
    preds2 = jax.random.normal(k3, (B2, C2), dtype=jnp.float32)
    target2 = jax.random.randint(k4, (B2,), 0, C2, dtype=jnp.int32)
    out2 = jax.block_until_ready(
        label_smoothing_cross_entropy(preds2, target2, block_rows=8))
    ref2 = _reference(preds2, target2)
    assert jnp.allclose(out2, ref2, atol=1e-5, rtol=1e-5), (out2, ref2)

    print("KERNEL_OK")
</pallas_src>

<mosaic_0001>
module attributes {stable_mosaic.version = 11 : i64} {
  func.func @_ls_ce_kernel(%arg0: i32, %arg1: memref<8x128xf32, #tpu.memory_space<vmem>>, %arg2: memref<8x1xi32, #tpu.memory_space<vmem>>, %arg3: memref<1x1x1xf32, #tpu.memory_space<vmem>>, %arg4: memref<1x1x1xf32, #tpu.memory_space<vmem>>) attributes {dimension_semantics = [#tpu.dimension_semantics<parallel>], iteration_bounds = array<i64: 1>, scalar_prefetch = 0 : i64, scratch_operands = 0 : i64, tpu.core_type = #tpu.core_type<tc>, window_params = [{transform_indices = @transform_0, window_bounds = array<i64: 8, 128>}, {transform_indices = @transform_1, window_bounds = array<i64: 8, 1>}, {transform_indices = @transform_2, window_bounds = array<i64: 1, 1, 1>}, {transform_indices = @transform_3, window_bounds = array<i64: 1, 1, 1>}]} {
    %c0 = arith.constant 0 : index
    %c0_0 = arith.constant 0 : index
    %0 = vector.load %arg1[%c0, %c0_0] : memref<8x128xf32, #tpu.memory_space<vmem>>, vector<8x128xf32>
    %1 = tpu.iota {dimensions = array<i32: 1>} : vector<8x128xi32>
    %c32_i32 = arith.constant 32 : i32
    %2 = vector.broadcast %c32_i32 : i32 to vector<8x128xi32>
    %3 = arith.cmpi slt, %1, %2 : vector<8x128xi32>
    %cst = arith.constant -1.000000e+30 : f32
    %4 = vector.broadcast %cst : f32 to vector<8x128xf32>
    %5 = arith.select %3, %0, %4 : vector<8x128xi1>, vector<8x128xf32>
    %cst_1 = arith.constant dense<0xFF800000> : vector<8xf32>
    %6 = vector.multi_reduction <maximumf>, %5, %cst_1 [1] : vector<8x128xf32> to vector<8xf32>
    %7 = vector.shape_cast %6 : vector<8xf32> to vector<8x1xf32>
    %8 = vector.broadcast %7 : vector<8x1xf32> to vector<8x128xf32>
    %9 = arith.subf %5, %8 : vector<8x128xf32>
    %10 = math.exp %9 : vector<8x128xf32>
    %cst_2 = arith.constant 0.000000e+00 : f32
    %11 = vector.broadcast %cst_2 : f32 to vector<8x128xf32>
    %12 = arith.select %3, %10, %11 : vector<8x128xi1>, vector<8x128xf32>
    %cst_3 = arith.constant 0.000000e+00 : f32
    %13 = vector.broadcast %cst_3 : f32 to vector<8x128xf32>
    %14 = arith.select %3, %9, %13 : vector<8x128xi1>, vector<8x128xf32>
    %cst_4 = arith.constant dense<0.000000e+00> : vector<8xf32>
    %15 = vector.multi_reduction <add>, %12, %cst_4 [1] : vector<8x128xf32> to vector<8xf32>
    %16 = vector.shape_cast %15 : vector<8xf32> to vector<8x1xf32>
    %17 = math.log %16 : vector<8x1xf32>
    %cst_5 = arith.constant dense<0.000000e+00> : vector<8xf32>
    %18 = vector.multi_reduction <add>, %14, %cst_5 [1] : vector<8x128xf32> to vector<8xf32>
    %19 = vector.shape_cast %18 : vector<8xf32> to vector<8x1xf32>
    %cst_6 = arith.constant 3.200000e+01 : f32
    %20 = vector.broadcast %cst_6 : f32 to vector<8x1xf32>
    %21 = arith.mulf %20, %17 : vector<8x1xf32>
    %22 = arith.subf %21, %19 : vector<8x1xf32>
    %c0_7 = arith.constant 0 : index
    %c0_8 = arith.constant 0 : index
    %23 = vector.load %arg2[%c0_7, %c0_8] : memref<8x1xi32, #tpu.memory_space<vmem>>, vector<8x1xi32>
    %24 = vector.broadcast %23 : vector<8x1xi32> to vector<8x128xi32>
    %25 = arith.cmpi eq, %1, %24 : vector<8x128xi32>
    %cst_9 = arith.constant 0.000000e+00 : f32
    %26 = vector.broadcast %cst_9 : f32 to vector<8x128xf32>
    %27 = arith.select %25, %9, %26 : vector<8x128xi1>, vector<8x128xf32>
    %cst_10 = arith.constant dense<0.000000e+00> : vector<8xf32>
    %28 = vector.multi_reduction <add>, %27, %cst_10 [1] : vector<8x128xf32> to vector<8xf32>
    %29 = vector.shape_cast %28 : vector<8xf32> to vector<8x1xf32>
    %30 = arith.subf %17, %29 : vector<8x1xf32>
    %31 = vector.shape_cast %22 : vector<8x1xf32> to vector<1x8x1xf32>
    %cst_11 = arith.constant dense<0.000000e+00> : vector<1xf32>
    %32 = vector.multi_reduction <add>, %31, %cst_11 [1, 2] : vector<1x8x1xf32> to vector<1xf32>
    %33 = vector.shape_cast %32 : vector<1xf32> to vector<1x1x1xf32>
    %34 = vector.extract %33[0, 0, 0] : f32 from vector<1x1x1xf32>
    %35 = vector.broadcast %34 : f32 to vector<1x1x1xf32>
    %c0_12 = arith.constant 0 : index
    %c0_13 = arith.constant 0 : index
    %c0_14 = arith.constant 0 : index
    %36 = vector.load %arg3[%c0_12, %c0_13, %c0_14] : memref<1x1x1xf32, #tpu.memory_space<vmem>>, vector<1x1x1xf32>
    tpu.vector_store %arg3[%c0_12, %c0_13, %c0_14], %35 {strides = array<i32>} : memref<1x1x1xf32, #tpu.memory_space<vmem>>, vector<1x1x1xf32>,
    %37 = vector.shape_cast %30 : vector<8x1xf32> to vector<1x8x1xf32>
    %cst_15 = arith.constant dense<0.000000e+00> : vector<1xf32>
    %38 = vector.multi_reduction <add>, %37, %cst_15 [1, 2] : vector<1x8x1xf32> to vector<1xf32>
    %39 = vector.shape_cast %38 : vector<1xf32> to vector<1x1x1xf32>
    %40 = vector.extract %39[0, 0, 0] : f32 from vector<1x1x1xf32>
    %41 = vector.broadcast %40 : f32 to vector<1x1x1xf32>
    %c0_16 = arith.constant 0 : index
    %c0_17 = arith.constant 0 : index
    %c0_18 = arith.constant 0 : index
    %42 = vector.load %arg4[%c0_16, %c0_17, %c0_18] : memref<1x1x1xf32, #tpu.memory_space<vmem>>, vector<1x1x1xf32>
    tpu.vector_store %arg4[%c0_16, %c0_17, %c0_18], %41 {strides = array<i32>} : memref<1x1x1xf32, #tpu.memory_space<vmem>>, vector<1x1x1xf32>,
    return
  }
  func.func @transform_0(%arg0: i32) -> (i32, i32) {
    %c0_i32 = arith.constant 0 : i32
    %c0_i32_0 = arith.constant 0 : i32
    return %arg0, %c0_i32 : i32, i32
  }
  func.func @transform_1(%arg0: i32) -> (i32, i32) {
    %c0_i32 = arith.constant 0 : i32
    %c0_i32_0 = arith.constant 0 : i32
    return %arg0, %c0_i32 : i32, i32
  }
  func.func @transform_2(%arg0: i32) -> (i32, i32, i32) {
    %c0_i32 = arith.constant 0 : i32
    %c0_i32_0 = arith.constant 0 : i32
    %c0_i32_1 = arith.constant 0 : i32
    return %arg0, %c0_i32, %c0_i32_0 : i32, i32, i32
  }
  func.func @transform_3(%arg0: i32) -> (i32, i32, i32) {
    %c0_i32 = arith.constant 0 : i32
    %c0_i32_0 = arith.constant 0 : i32
    %c0_i32_1 = arith.constant 0 : i32
    return %arg0, %c0_i32, %c0_i32_0 : i32, i32, i32
  }
}

</mosaic_0001>

<bundles_post_ra>
// kernel: label_smoothing_cross_entropy.1
= control target key start
LH: loop header
LB: loop body
LE: loop exit
PB: predicated region body
PF: predicated region fallthrough
CT: control target
= control target key end

     0   :  { %9 = vsyncpa [#allocation3], 0  ;;  %v16_v0 = vlaneseq  ;;  %s191_s0 = inlined_call_operand.vmem [shape: f32[8,128], index: 0, kind: input, shape index: {}]   ;;  %s192_s1 = inlined_call_operand.vmem [shape: s32[8,1], index: 1, kind: input, shape index: {}]   ;;  %s193_s2 = inlined_call_operand.hbm [shape: f32[1,1,1], index: 2, kind: output, shape index: {0}]   ;;  %s194_s3 = inlined_call_operand.hbm [shape: f32[1,1,1], index: 3, kind: output, shape index: {1}]  }
   0x1   :  { %10 = vsyncpa [#allocation5], 0  ;;  %v154_v1 = vmov 0   ;;  %v15_v2 = vld [vmem:[%s191_s0] sm:$0xff]  ;;  %vm44_vm2 = vcmask 7168   ;;  %s155_s0 = smov [#allocation2]  }
   0x2   :  { %105 = vset.pattern.permute.xlu0 %v154_v1  ;;  %v17_v3 = vand.u32 127, %v16_v0  ;;  %v35_v5 = vld [vmem:[%s192_s1] sm:$0xff]  ;;  %s76_s1 = sshll.u32 %s155_s0, 4  ;;  %vm56_vm3 = vcmask 0   ;;  %s156_s17 = smov [#allocation4]   ;;  %s77_s1 = int_to_ptr.vmem [resolvable:$true] %s76_s1 }
   0x3   :  { %s86_s18 = sshll.u32 %s156_s17, 4  ;;  %s110_s19 = scalar_lea.vmem %s77_s1, 16  ;;  %s87_s18 = int_to_ptr.vmem [resolvable:$true] %s86_s18 }
   0x4   :  { %vm18_vm0 = vcmp.lt.s32.totalorder %v17_v3, 32  ;;  %p111_p0 = scmp.ne.s32.totalorder %s77_s1, %s110_s19  ;;  %s114_s20 = scalar_lea.vmem %s77_s1, 32 }
   0x5   :  { %v19_v4 = vsel %vm18_vm0, %v15_v2, -1e+30  ;;  %p115_p1 = scmp.lt.s32.totalorder %s77_s1, %s77_s1  ;;  %p116_p2 = scmp.lt.s32.totalorder %s114_s20, %s110_s19 }
   0x6   :  { %20 = vmax.xlane.f32.xlu0 %v19_v4 }
   0x7   :  { %p117_p3 = por %p116_p2, %p115_p1 }
   0x9   :  { %p118_p4 = pnand %p117_p3, %p111_p0 }
  0x1c   :  { %37 = vperm.xlu0 %105, %v35_v5  }
  0x8f   :  { %v21_v6 = vpop.xlane.xlu0 %20 }
  0x90   :  { %v22_v7 = vsub.f32 %v19_v4, %v21_v6 }
  0x92   :  { %v23_v8 = vmul.f32 1.442695, %v22_v7  ;;  %v26_v12 = vsel %vm18_vm0, %v22_v7, 0.0 }
  0x94   :  { %106 = vpow2.f32 %v23_v8 }
  0x97   :  { %v38_v11 = vpop.permute.xlu0 %37 }
  0x98   :  { %vm39_vm1 = vcmp.eq.s32.totalorder %v17_v3, %v38_v11 }
  0x99   :  { %v40_v13 = vsel %vm39_vm1, %v22_v7, 0.0 }
  0xa1   :  { %v107_v9 = vpop.eup %106 }
  0xa2   :  { %v25_v10 = vsel %vm18_vm0, %v107_v9, 0.0 }
  0xa3   :  { %27 = vadd.xlane.f32.xlu1 %v25_v10 }
  0xa7   :  { %31 = vadd.xlane.f32.xlu1 %v26_v12 }
  0xab   :  { %41 = vadd.xlane.f32.xlu1 %v40_v13 }
 0x12c   :  { %v28_v14 = vpop.xlane.xlu1 %27 }
 0x12d   :  { %108 = vlog2.f32 %v28_v14 }
 0x130   :  { %v32_v16 = vpop.xlane.xlu1 %31 }
 0x134   :  { %v42_v20 = vpop.xlane.xlu1 %41 }
 0x13a   :  { %v109_v15 = vpop.eup %108 }
 0x13b   :  { %v30_v17 = vmul.f32 0.6931472, %v109_v15 }
 0x13d   :  { %v33_v18 = vmul.f32 32.0, %v30_v17  ;;  %v43_v21 = vsub.f32 %v30_v17, %v42_v20 }
 0x13f   :  { %v34_v19 = vsub.f32 %v33_v18, %v32_v16  ;;  %v58_v23 = vsel %vm44_vm2, %v43_v21, 0.0 }
 0x141   :  { %v45_v22 = vsel %vm44_vm2, %v34_v19, 0.0 }
 0x142   :  { %46 = vadd.xlane.f32.xlu1 %v45_v22 }
 0x146   :  { %59 = vadd.xlane.f32.xlu1 %v58_v23 }
 0x1cb   :  { %v47_v24 = vpop.xlane.xlu1 %46 }
 0x1cc   :  { %v48_v25 = vrot.slane %v47_v24, 4 }
 0x1ce   :  { %v49_v26 = vadd.f32 %v48_v25, %v47_v24 }
 0x1cf   :  { %v60_v27 = vpop.xlane.xlu1 %59 }
 0x1d0   :  { %v50_v28 = vrot.slane %v49_v26, 2  ;;  %v61_v29 = vrot.slane %v60_v27, 4 }
 0x1d2   :  { %v62_v30 = vadd.f32 %v61_v29, %v60_v27  ;;  %v51_v31 = vadd.f32 %v50_v28, %v49_v26 }
 0x1d4   :  { %v63_v32 = vrot.slane %v62_v30, 2  ;;  %v52_v33 = vrot.slane %v51_v31, 1 }
 0x1d6   :  { %v64_v34 = vadd.f32 %v63_v32, %v62_v30  ;;  %v53_v35 = vadd.f32 %v52_v33, %v51_v31 }
 0x1d8   :  { %98 = vpush %v53_v35  ;;  %v65_v36 = vrot.slane %v64_v34, 1 }
 0x1da   :  { %v66_v37 = vadd.f32 %v65_v36, %v64_v34 }
 0x1dc   :  { %100 = vpush %v66_v37 }
 0x209   :  { %s99_s16 = spop %98 }
 0x20a   :  { %v55_v38 = vstv %s99_s16 }
 0x20b   :  { %57 = vst.msk [vmem:[#allocation2] sm:$0x1] %vm56_vm3, %v55_v38 }
 0x20c   :  { %121 = shalt.err (!%p118_p4)
}
 0x20d   :  { %79 = dma.vmem_to_hbm [thread:$0]  %s77_s1, 16, %s193_s2, [#allocation3]  }
 0x20e   :  { %s101_s23 = spop %100  ;;  %s130_s24 = scalar_lea.vmem %s87_s18, 16 }
 0x20f   :  { %v68_v39 = vstv %s101_s23  ;;  %p131_p5 = scmp.ne.s32.totalorder %s87_s18, %s130_s24  ;;  %s134_s25 = scalar_lea.vmem %s87_s18, 32 }
 0x210   :  { %69 = vst.msk [vmem:[#allocation4] sm:$0x1] %vm56_vm3, %v68_v39  ;;  %p135_p6 = scmp.lt.s32.totalorder %s87_s18, %s87_s18  ;;  %p136_p7 = scmp.lt.s32.totalorder %s134_s25, %s130_s24 }
 0x212   :  { %p137_p8 = por %p136_p7, %p135_p6 }
 0x214   :  { %p138_p9 = pnand %p137_p8, %p131_p5 }
 0x216   :  { %141 = shalt.err (!%p138_p9)
}
 0x217   :  { %89 = dma.vmem_to_hbm [thread:$0]  %s87_s18, 16, %s194_s3, [#allocation5]  }
 0x218   :  { %150 = dma.done.wait [#allocation3], 16  }
 0x219   :  { %151 = vsyncadd [#allocation3], 4294967280 }
 0x21a   :  { %152 = dma.done.wait [#allocation5], 16  }
 0x21b   :  { %153 = vsyncadd [#allocation5], 4294967280 }
 0x21c   :  { %96 = vsyncpa [#allocation3], 1 }
 0x21d   :  { %97 = vsyncpa [#allocation5], 1 }

</bundles_post_ra>
